<compile_context>
chip_gen: v6e
topology: v6e:2x2x1
jax: 0.10.0
libtpu: 0.0.40
codegen_flags: <defaults>
</compile_context>

<pallas_src>
import functools

import jax
import jax.numpy as jnp
from jax.experimental import pallas as pl
from jax.experimental.pallas import tpu as pltpu


def _div_mod_const(idx, c):
    """Exact (idx // c, idx % c) for non-negative int32 idx and Python int c > 0."""
    if c == 1:
        return idx, jnp.zeros_like(idx)
    if (c & (c - 1)) == 0:  # power of two -> shift / mask (pure VPU bit ops)
        shift = c.bit_length() - 1
        return jnp.right_shift(idx, shift), jnp.bitwise_and(idx, c - 1)
    q = idx // c            # general case: vector integer division by a constant
    return q, idx - q * c


def _affine_grid_kernel(theta_sm, out_ref, *, dim, size, tile_n):
    # theta_sm: SMEM f32[B*dim*(dim+1)]  (scalar prefetch)
    # out_ref : VMEM f32[dim, tile_n]    block of the [B, dim, N_padded] output
    bi = pl.program_id(0)
    ji = pl.program_id(1)

    # Linear (row-major / 'ij') index of every element of this tile.
    idx = jax.lax.broadcasted_iota(jnp.int32, (1, tile_n), 1) + ji * tile_n

    # Decompose the linear index into per-dimension integer coordinates,
    # innermost dimension first, entirely on the VPU (no mesh from HBM).
    coords_f = [None] * dim
    rem = idx
    for d in range(dim - 1, -1, -1):
        rem, coord = _div_mod_const(rem, size[d])
        coords_f[d] = coord.astype(jnp.float32)

    # out[r, :] = sum_k theta[b, r, k] * coord_k + theta[b, r, dim]
    tbase = bi * (dim * (dim + 1))
    for r in range(dim):
        toff = tbase + r * (dim + 1)
        acc = coords_f[0] * theta_sm[toff]
        for k in range(1, dim):
            acc = acc + coords_f[k] * theta_sm[toff + k]
        acc = acc + theta_sm[toff + dim]
        out_ref[pl.ds(r, 1), :] = acc


def make_affine_grid(size, *, max_tile_n=8192):
    """Returns apply(theta) reproducing AffineGrid(size).forward (PyTorch)."""
    size = tuple(int(s) for s in size)
    dim = len(size)
    n = 1
    for s in size:
        n *= s

    # Large lane-dense tiles along the flattened spatial axis: multiple of 128,
    # capped so the (dim, tile_n) output block is tiny in VMEM on v5e/v6e/v7x.
    n_rounded = ((n + 127) // 128) * 128
    tile_n = min(n_rounded, max_tile_n)
    num_tiles = (n + tile_n - 1) // tile_n
    n_padded = num_tiles * tile_n

    kernel = functools.partial(
        _affine_grid_kernel, dim=dim, size=size, tile_n=tile_n)

    def apply(theta):
        assert theta.ndim == 3 and theta.shape[1] == dim and theta.shape[2] == dim + 1
        b = theta.shape[0]
        theta_flat = theta.astype(jnp.float32).reshape(b * dim * (dim + 1))

        cost = pl.CostEstimate(
            flops=2 * b * dim * (dim + 1) * n,
            transcendentals=0,
            bytes_accessed=b * dim * n_padded * 4 + theta_flat.size * 4,
        )

        out = pl.pallas_call(
            kernel,
            out_shape=jax.ShapeDtypeStruct((b, dim, n_padded), jnp.float32),
            grid_spec=pltpu.PrefetchScalarGridSpec(
                num_scalar_prefetch=1,          # theta lives in SMEM as scalars
                grid=(b, num_tiles),
                in_specs=[],                    # write-only kernel: no HBM inputs
                out_specs=pl.BlockSpec(
                    (None, dim, tile_n), lambda bi, ji, theta_ref: (bi, 0, ji)),
            ),
            compiler_params=pltpu.CompilerParams(
                dimension_semantics=("parallel", "parallel")),
            cost_estimate=cost,
        )(theta_flat)

        # Crop the padded tail tile and restore the spatial shape.
        return out[:, :, :n].reshape(-1, dim, *size)

    return apply


if __name__ == "__main__":
    size = (16, 16)          # vol_shape -> dim = 2, N = 256
    batch = 2
    dim = len(size)

    key = jax.random.PRNGKey(0)
    theta = jax.random.normal(key, (batch, dim, dim + 1), dtype=jnp.float32)

    affine_grid = make_affine_grid(size)
    out = jax.block_until_ready(affine_grid(theta))

    # Reference (pure JAX, mirrors the PyTorch module exactly).
    vecs = [jnp.arange(0, s, dtype=jnp.float32) for s in size]
    mesh = jnp.stack(jnp.meshgrid(*vecs, indexing="ij")).reshape(dim, -1)
    mesh_aug = jnp.concatenate(
        [mesh, jnp.ones((1, mesh.shape[1]), jnp.float32)], axis=0)
    ref = jnp.matmul(theta, mesh_aug).reshape(-1, dim, *size)

    assert out.shape == (batch, dim, *size)
    assert jnp.allclose(out, ref, atol=1e-5, rtol=1e-5)
    print("KERNEL_OK")
</pallas_src>

<mosaic_0001>
module attributes {stable_mosaic.version = 11 : i64} {
  func.func @_affine_grid_kernel(%arg0: i32, %arg1: i32, %arg2: memref<12xf32, #tpu.memory_space<smem>>, %arg3: memref<1x2x256xf32, #tpu.memory_space<vmem>>) attributes {dimension_semantics = [#tpu.dimension_semantics<parallel>, #tpu.dimension_semantics<parallel>], iteration_bounds = array<i64: 2, 1>, scalar_prefetch = 1 : i64, scratch_operands = 0 : i64, tpu.core_type = #tpu.core_type<tc>, window_params = [{transform_indices = @transform_0, window_bounds = array<i64: 1, 2, 256>}]} {
    %0 = tpu.iota {dimensions = array<i32: 1>} : vector<1x256xi32>
    %c256_i32 = arith.constant 256 : i32
    %1 = arith.muli %arg1, %c256_i32 : i32
    %2 = vector.broadcast %1 : i32 to vector<1x256xi32>
    %3 = arith.addi %0, %2 : vector<1x256xi32>
    %c4_i32 = arith.constant 4 : i32
    %4 = vector.broadcast %c4_i32 : i32 to vector<1x256xi32>
    %5 = arith.shrsi %3, %4 : vector<1x256xi32>
    %c15_i32 = arith.constant 15 : i32
    %6 = vector.broadcast %c15_i32 : i32 to vector<1x256xi32>
    %7 = arith.andi %3, %6 : vector<1x256xi32>
    %8 = arith.sitofp %7 : vector<1x256xi32> to vector<1x256xf32>
    %c15_i32_0 = arith.constant 15 : i32
    %9 = vector.broadcast %c15_i32_0 : i32 to vector<1x256xi32>
    %10 = arith.andi %5, %9 : vector<1x256xi32>
    %11 = arith.sitofp %10 : vector<1x256xi32> to vector<1x256xf32>
    %c6_i32 = arith.constant 6 : i32
    %12 = arith.muli %arg0, %c6_i32 : i32
    %c0_i32 = arith.constant 0 : i32
    %13 = arith.addi %12, %c0_i32 : i32
    %14 = arith.index_cast %13 : i32 to index
    %15 = memref.load %arg2[%14] : memref<12xf32, #tpu.memory_space<smem>>
    %16 = vector.broadcast %15 : f32 to vector<1x256xf32>
    %17 = arith.mulf %11, %16 : vector<1x256xf32>
    %c1_i32 = arith.constant 1 : i32
    %18 = arith.addi %13, %c1_i32 : i32
    %19 = arith.index_cast %18 : i32 to index
    %20 = memref.load %arg2[%19] : memref<12xf32, #tpu.memory_space<smem>>
    %21 = vector.broadcast %20 : f32 to vector<1x256xf32>
    %22 = arith.mulf %8, %21 : vector<1x256xf32>
    %23 = arith.addf %17, %22 : vector<1x256xf32>
    %c2_i32 = arith.constant 2 : i32
    %24 = arith.addi %13, %c2_i32 : i32
    %25 = arith.index_cast %24 : i32 to index
    %26 = memref.load %arg2[%25] : memref<12xf32, #tpu.memory_space<smem>>
    %27 = vector.broadcast %26 : f32 to vector<1x256xf32>
    %28 = arith.addf %23, %27 : vector<1x256xf32>
    %c0 = arith.constant 0 : index
    %c0_1 = arith.constant 0 : index
    %c0_2 = arith.constant 0 : index
    %29 = vector.load %arg3[%c0, %c0_1, %c0_2] : memref<1x2x256xf32, #tpu.memory_space<vmem>>, vector<1x1x256xf32>
    %30 = vector.shape_cast %29 : vector<1x1x256xf32> to vector<1x256xf32>
    %31 = vector.shape_cast %28 : vector<1x256xf32> to vector<1x1x256xf32>
    tpu.vector_store %arg3[%c0, %c0_1, %c0_2], %31 {strides = array<i32>} : memref<1x2x256xf32, #tpu.memory_space<vmem>>, vector<1x1x256xf32>,
    %c3_i32 = arith.constant 3 : i32
    %32 = arith.addi %12, %c3_i32 : i32
    %33 = arith.index_cast %32 : i32 to index
    %34 = memref.load %arg2[%33] : memref<12xf32, #tpu.memory_space<smem>>
    %35 = vector.broadcast %34 : f32 to vector<1x256xf32>
    %36 = arith.mulf %11, %35 : vector<1x256xf32>
    %c1_i32_3 = arith.constant 1 : i32
    %37 = arith.addi %32, %c1_i32_3 : i32
    %38 = arith.index_cast %37 : i32 to index
    %39 = memref.load %arg2[%38] : memref<12xf32, #tpu.memory_space<smem>>
    %40 = vector.broadcast %39 : f32 to vector<1x256xf32>
    %41 = arith.mulf %8, %40 : vector<1x256xf32>
    %42 = arith.addf %36, %41 : vector<1x256xf32>
    %c2_i32_4 = arith.constant 2 : i32
    %43 = arith.addi %32, %c2_i32_4 : i32
    %44 = arith.index_cast %43 : i32 to index
    %45 = memref.load %arg2[%44] : memref<12xf32, #tpu.memory_space<smem>>
    %46 = vector.broadcast %45 : f32 to vector<1x256xf32>
    %47 = arith.addf %42, %46 : vector<1x256xf32>
    %c0_5 = arith.constant 0 : index
    %c1 = arith.constant 1 : index
    %c0_6 = arith.constant 0 : index
    %48 = vector.load %arg3[%c0_5, %c1, %c0_6] : memref<1x2x256xf32, #tpu.memory_space<vmem>>, vector<1x1x256xf32>
    %49 = vector.shape_cast %48 : vector<1x1x256xf32> to vector<1x256xf32>
    %50 = vector.shape_cast %47 : vector<1x256xf32> to vector<1x1x256xf32>
    tpu.vector_store %arg3[%c0_5, %c1, %c0_6], %50 {strides = array<i32>} : memref<1x2x256xf32, #tpu.memory_space<vmem>>, vector<1x1x256xf32>,
    return
  }
  func.func @transform_0(%arg0: i32, %arg1: i32, %arg2: memref<12xf32, #tpu.memory_space<smem>>) -> (i32, i32, i32) {
    %c0_i32 = arith.constant 0 : i32
    %c0_i32_0 = arith.constant 0 : i32
    return %arg0, %c0_i32, %arg1 : i32, i32, i32
  }
}

</mosaic_0001>

<bundles_post_ra>
// kernel: tpu_custom_call.1
= control target key start
LH: loop header
LB: loop body
LE: loop exit
PB: predicated region body
PF: predicated region fallthrough
CT: control target
= control target key end

     0   :  { %s348_s6 = smov [#allocation3]   ;;  %s439_s0 = inlined_call_operand.hbm [shape: f32[12], index: 0, kind: input, shape index: {}]   ;;  %s440_s1 = inlined_call_operand.hbm [shape: f32[2,2,256], index: 1, kind: output, shape index: {}]  }
   0x1   :  { %7 = dma.hbm_to_smem %s439_s0, 16, %s348_s6, [#allocation2] }
   0x2   :  { %326 = dma.done.wait [#allocation2], 16 }
   0x3   :  { %327 = vsyncadd [#allocation2], 4294967280 }
   0x4   :  { %9 = sfence }
   0x5   :  { %10 = vsyncpa [#allocation5], 0 }
   0x6   :  { %12 = vsyncpa [#allocation5 + $0x1], 0  ;;  %s364_s9 = smov 0   ;;  %s366_s10 = smov 0  }
   0x7   :  { %s368_s11 = smov 0   ;;  %s370_s12 = smov 0  }
   0x8 LB: > { %s27_s0 = sadd.s32 1, %s342_s11  ;;  %s224_s13 = sadd.s32 4294967295, %s346_s12   ;;  %s346_s12 = sphi %s370_s12, %s18_s12   ;;  %s342_s11 = sphi %s368_s11, %s445_s11   ;;  %s338_s10 = sphi %s366_s10, %s444_s10   ;;  %s334_s9 = sphi %s364_s9, %s443_s9  }
   0x9   : > { %p29_p0 = scmp.ge.s32.totalorder %s27_s0, 2  ;;  %p45_p1 = scmp.ne.s32.totalorder %s338_s10, %s334_s9 }
   0xa   : > { %s36_s14 = sadd.s32 1, %s338_s10  ;;  %p46_p2 = scmp.eq.s32.totalorder %s224_s13, 1 }
   0xb   : > { %s447_s0 = smov (%p29_p0, %s27_s0), 0  ;;  %p40_p3 = scmp.eq.s32.totalorder %s346_s12, 1 }
   0xc   : > { %s31_s15 = ssub.s32 %s342_s11, %s447_s0  ;;  %p394_p6 = por %p46_p2, %p45_p1 }
   0xd   : > { %p34_p4 = scmp.eq.s32.totalorder %s31_s15, 0  ;;  %p225_p5 = scmp.ne.s32.totalorder %s31_s15, 0 }
   0xe   : > { %p226_p8 = scmp.ge.s32.totalorder %s346_s12, 2 }
   0xf   : > { %s399_s17 = scalar_select %p34_p4, %s338_s10, %s36_s14  }
  0x10   : > { %p401_p7 = por %p225_p5, %p40_p3  ;;  %55 = sbr.rel (%p226_p8) target bundleno = 48 (0x30), region = 12 }
  0x11   : > { %s81_s19 = smul.u32 (!%p226_p8), 6, %s342_s11  ;;  %s60_s2 = sand.u32 (!%p226_p8), 1, %s338_s10  }
  0x12   : > { %s227_s3 = sshll.u32 (!%p226_p8), %s60_s2, 2  ;;  %s234_s6 = sshll.u32 (!%p226_p8), %s342_s11, 6 }
  0x13   : > { %s82_s20 = sld [smem:[#allocation3 + %s81_s19]] (!%p226_p8)  ;;  %s86_s21 = sadd.s32 (!%p226_p8), 1, %s81_s19 }
  0x14   : > { %s93_s22 = sadd.s32 (!%p226_p8), 2, %s81_s19  ;;  %s87_s23 = sld [smem:[#allocation3 + %s86_s21]] (!%p226_p8) }
  0x15   : > { %v64_v0 = vlaneseq  ;;  %s407_s24 = sld [smem:[#allocation3 + %s93_s22]]  ;;  %s121_s25 = sadd.s32 3, %s81_s19  ;;  %v349_v9 = vmov 1966171168  }
  0x16   : > { %s126_s26 = sadd.s32 4, %s81_s19  ;;  %v102_v10 = vunpack.c.l.s4 %v349_v9  ;;  %s122_s27 = sld [smem:[#allocation3 + %s121_s25]] }
  0x17   : > { %v65_v1 = vand.u32 127, %v64_v0  ;;  %s133_s28 = sadd.s32 5, %s81_s19  ;;  %s127_s29 = sld [smem:[#allocation3 + %s126_s26]]  ;;  %v105_v23 = vshrl.u32 %v64_v0, 7  ;;  %vm118_vm0 = vcmp.lt.s32.totalorder %v64_v0, 256 }
  0x18   : > { %s134_s30 = sld [smem:[#allocation3 + %s133_s28]]  ;;  %v103_v22 = vunpack.c.0.s8 %v102_v10  ;;  %s62_s4 = scalar_lea.vmem [#allocation4], %s227_s3 }
  0x19   : > { %v66_v2 = vadd.s32 128, %v65_v1  ;;  %v71_v3 = vshra.s32 %v65_v1, 4  ;;  %v73_v4 = vand.u32 15, %v65_v1  ;;  %v83_v14 = vstv %s82_s20  ;;  %s175_s5 = sshll.u32 %s62_s4, 4  ;;  %s173_s13 = scalar_lea.hbm %s440_s1, %s234_s6  ;;  %s176_s5 = int_to_ptr.vmem [resolvable:$true] %s175_s5 }
  0x1a   : > { %v88_v17 = vstv %s87_s23  ;;  %v106_v34 = vsub.s32 %v103_v22, %v105_v23  ;;  %s159_s14 = scalar_lea.sflag [#allocation5], %s60_s2  ;;  %s284_s15 = scalar_lea.vmem %s176_s5, 64 }
  0x1b   : > { %v72_v5 = vshra.s32 %v66_v2, 4  ;;  %v74_v6 = vand.u32 15, %v66_v2  ;;  %v77_v7 = vand.u32 15, %v71_v3  ;;  %v75_v8 = vcvt.s32.f32 %v73_v4  ;;  %p285_p9 = scmp.ne.s32.totalorder %s176_s5, %s284_s15  ;;  %s350_s19 = smov [#allocation4]  }
  0x1c   : > { %v95_v21 = vstv %s407_s24  ;;  %v123_v25 = vstv %s122_s27  ;;  %s288_s20 = sshll.u32 %s350_s19, 4  ;;  %s289_s20 = int_to_ptr.vmem [resolvable:$false] %s288_s20 }
  0x1d   : > { %v76_v11 = vcvt.s32.f32 %v74_v6  ;;  %v78_v12 = vand.u32 15, %v72_v5  ;;  %v79_v13 = vcvt.s32.f32 %v77_v7  ;;  %v89_v18 = vmul.f32 %v88_v17, %v75_v8  ;;  %p286_p10 = pnand %p285_p9, %p401_p7  ;;  %s290_s11 = scalar_lea.vmem %s289_s20, 128 }
  0x1e   : > { %v128_v29 = vstv %s127_s29  ;;  %v135_v35 = vstv %s134_s30  ;;  %p291_p12 = scmp.lt.s32.totalorder %s176_s5, %s289_s20  ;;  %p292_p13 = scmp.lt.s32.totalorder %s290_s11, %s284_s15 }
  0x1f   : > { %v80_v15 = vcvt.s32.f32 %v78_v12  ;;  %v84_v16 = vmul.f32 %v83_v14, %v79_v13  ;;  %v90_v19 = vmul.f32 %v88_v17, %v76_v11  ;;  %v124_v27 = vmul.f32 %v123_v25, %v79_v13  ;;  %p287_p11 = pneg %p286_p10 }
  0x20   : > { %v129_v31 = vmul.f32 %v128_v29, %v75_v8  ;;  %v130_v32 = vmul.f32 %v128_v29, %v76_v11  ;;  %p293_p0 = por %p292_p13, %p291_p12 }
  0x21   : > { %v85_v20 = vmul.f32 %v83_v14, %v80_v15  ;;  %v91_v24 = vadd.f32 %v89_v18, %v84_v16  ;;  %v125_v28 = vmul.f32 %v123_v25, %v80_v15 }
  0x22   : > { %v131_v36 = vadd.f32 %v129_v31, %v124_v27  ;;  %p294_p1 = pnand %p293_p0, %p287_p11 }
  0x23   : > { %v92_v26 = vadd.f32 %v90_v19, %v85_v20  ;;  %v96_v30 = vadd.f32 %v95_v21, %v91_v24  ;;  %v132_v37 = vadd.f32 %v130_v32, %v125_v28 }
  0x24   : > { %v136_v39 = vadd.f32 %v135_v35, %v131_v36 }
  0x25   : > { %v97_v33 = vadd.f32 %v95_v21, %v92_v26  ;;  %v137_v40 = vadd.f32 %v135_v35, %v132_v37 }
  0x27   : > { %v100_v38 = vcombine.low %v96_v30, %v97_v33  ;;  %v140_v42 = vcombine.low %v136_v39, %v137_v40 }
  0x29   : > { %v107_v41 = vrot.slane %v100_v38, %v106_v34  ;;  %v147_v44 = vrot.slane %v140_v42, %v106_v34 }
  0x2b   : > { %v114_v43 = vrot.slane %v107_v41, %v106_v34  ;;  %v154_v45 = vrot.slane %v147_v44, %v106_v34 }
  0x2d   : > { %120 = vst.msk [vmem:[%s62_s4] ss:$2 sm:$0x3] %vm118_vm0, %v114_v43  ;;  %228 = vst.msk [vmem:[%s62_s4 + $0x1] ss:$2 sm:$0x3] %vm118_vm0, %v154_v45 }
  0x2e   : > { %297 = shalt.err (!%p294_p1)
}
  0x2f   : > { %235 = dma.vmem_to_hbm [thread:$0]  (%p401_p7), %s176_s5, 64, %s173_s13, %s159_s14  }
  0x30 PF: > { %p241_p2 = scmp.ge.s32.totalorder %s346_s12, 1  ;;  %s187_s21 = sand.u32 1, %s334_s9  }
  0x31   : > { %s188_s22 = scalar_lea.sflag [#allocation5], %s187_s21 }
  0x32   : > { %p238_p3 = pnand %p241_p2, %p394_p6 }
  0x34   : > { %p239_p4 = pneg %p238_p3 }
  0x36   : > { %329 = dma.done.wait (%p239_p4), %s188_s22, 64  }
  0x37   : > { %331 = vsyncadd (%p239_p4), %s188_s22, 4294967232  ;;  %s18_s12 = sadd.s32 1, %s346_s12   ;;  %s443_s9 = smov %s338_s10 }
  0x38   : > { %p15_p5 = scmp.ge.s32.totalorder %s18_s12, 3   ;;  %s444_s10 = smov %s399_s17 }
  0x39   : > { %s445_s11 = smov %s447_s0 }
  0x3a   :  { %17 = sbr.rel (!%p15_p5) target bundleno = 8 (0x8), region = 45 }
  0x3f   :  { %193 = vsyncpa [#allocation5], 1 }
  0x40   :  { %195 = vsyncpa [#allocation5 + $0x1], 1 }

</bundles_post_ra>
